<compile_context>
chip_gen: v7x
topology: tpu7x:2x2x1
jax: 0.10.0
libtpu: 0.0.40
codegen_flags: <defaults>
</compile_context>

<pallas_src>
import functools

import jax
import jax.numpy as jnp
from jax import lax
from jax.experimental import pallas as pl
from jax.experimental.pallas import tpu as pltpu


def _round_up(x, m):
    return ((x + m - 1) // m) * m


def _cascade_kernel(x_ref, w_ref, wt_ref, p_ref, bo_ref, o_ref, *, num_layers):
    """One batch tile of the cascade, batch on the lane axis.

    x_ref  : (Din, TB)      bf16  transposed input tile (batch on lanes)
    w_ref  : (De,  Din)     bf16  W, resident across grid steps
    wt_ref : (Din, De)      bf16  W transposed, resident
    p_ref  : (De,  3L)      f32   cols [0,L)=beta, [L,2L)=beta*bias, [2L,3L)=alpha
    bo_ref : (Din, 1)       f32   output bias (broadcast over lanes)
    o_ref  : (Din, TB)      f32   transposed output tile
    """
    L = num_layers
    xT = x_ref[...]                                   # (Din, TB) bf16
    w = w_ref[...]                                    # (De, Din) bf16
    wt = wt_ref[...]                                  # (Din, De) bf16

    # base_T = W @ x_T  -> (De, TB) f32; computed once, reused by every skip.
    baseT = lax.dot_general(
        w, xT, (((1,), (0,)), ((), ())), preferred_element_type=jnp.float32)

    # Hoisted parameter column loads (static indices).  Each is (De, 1) and
    # broadcasts over the lane (batch) axis.
    beta = [p_ref[:, i:i + 1] for i in range(L)]
    bb = [p_ref[:, L + i:L + i + 1] for i in range(L)]      # beta_i * bias_i
    alpha = [p_ref[:, 2 * L + i:2 * L + i + 1] for i in range(L)]
    bias_o = bo_ref[...]                                     # (Din, 1)

    # z = beta_0 * base + bb_0 ;  z = (beta_i*base + bb_i) + alpha_{i-1}*tanh(z)
    z = beta[0] * baseT + bb[0]
    for i in range(1, L):
        z = (beta[i] * baseT + bb[i]) + alpha[i - 1] * jnp.tanh(z)
    z = alpha[L - 1] * jnp.tanh(z)

    # out_T = W^T @ z  -> (Din, TB) f32, then add output bias.
    outT = lax.dot_general(
        wt, z.astype(jnp.bfloat16), (((1,), (0,)), ((), ())),
        preferred_element_type=jnp.float32)
    o_ref[...] = (outT + bias_o).astype(o_ref.dtype)


def cascade_grad_net(x, W, bias_e, bias_o, beta, alpha, *, num_layers,
                     block_batch=4096):
    """x:(B,in_dim)  W:(embed,in)  bias_e:(L,embed)  bias_o:(in,)
       beta,alpha:(L,embed).  Returns (B, in_dim)."""
    assert num_layers >= 1
    B, in_dim = x.shape
    embed_dim = W.shape[0]
    L = num_layers

    # Batch lives on the lane axis -> tile width must be a multiple of 128.
    # Cap at ceil(B/2) (rounded to 128) so the grid has >= 2 steps when B>128
    # (keeps both v7x TensorCores busy); v5e/v6e are unaffected.
    TB = min(block_batch, max(128, _round_up(pl.cdiv(B, 2), 128)))
    Bp = _round_up(B, TB)

    # Transposed, bf16 input: (in_dim, Bp), batch on lanes.  Padded batch
    # columns are zero and get sliced off after the kernel.
    xT = jnp.zeros((in_dim, Bp), jnp.bfloat16)
    xT = xT.at[:, :B].set(x.astype(jnp.bfloat16).T)

    W_bf = W.astype(jnp.bfloat16)            # (embed, in)
    Wt_bf = W_bf.T                           # (in, embed)

    # Packed per-layer parameter columns: beta | beta*bias (pre-folded) | alpha.
    pack = jnp.concatenate(
        [beta.astype(jnp.float32).T,
         (beta * bias_e).astype(jnp.float32).T,
         alpha.astype(jnp.float32).T], axis=1)          # (embed_dim, 3L)
    bo = bias_o.reshape(in_dim, 1).astype(jnp.float32)  # (in_dim, 1)

    outT = pl.pallas_call(
        functools.partial(_cascade_kernel, num_layers=L),
        out_shape=jax.ShapeDtypeStruct((in_dim, Bp), jnp.float32),
        grid=(Bp // TB,),
        in_specs=[
            pl.BlockSpec((in_dim, TB), lambda i: (0, i)),          # x tiles
            pl.BlockSpec((embed_dim, in_dim), lambda i: (0, 0)),   # W, resident
            pl.BlockSpec((in_dim, embed_dim), lambda i: (0, 0)),   # W^T, resident
            pl.BlockSpec((embed_dim, 3 * L), lambda i: (0, 0)),    # params, resident
            pl.BlockSpec((in_dim, 1), lambda i: (0, 0)),           # out bias, resident
        ],
        out_specs=pl.BlockSpec((in_dim, TB), lambda i: (0, i)),
        compiler_params=pltpu.CompilerParams(
            dimension_semantics=("parallel",)),
    )(xT, W_bf, Wt_bf, pack, bo)

    # Small, narrow post-kernel transpose back to the module's (B, in_dim).
    return outT[:, :B].T.astype(x.dtype)


def _reference(x, W, bias_e, bias_o, beta, alpha, num_layers,
               mxu_dtype=jnp.float32):
    """Pure-JAX transcription of the PyTorch forward (activation = tanh).
    mxu_dtype=bf16 mirrors the kernel's matmul-operand precision."""
    Wc = W.astype(mxu_dtype)
    base = jnp.dot(x.astype(mxu_dtype), Wc.T,
                   preferred_element_type=jnp.float32)
    z = beta[0] * (base + bias_e[0])
    for i in range(1, num_layers):
        skip = beta[i] * (base + bias_e[i])
        z = skip + alpha[i - 1] * jnp.tanh(z)
    z = alpha[num_layers - 1] * jnp.tanh(z)
    out = jnp.dot(z.astype(mxu_dtype), Wc,
                  preferred_element_type=jnp.float32)
    return out + bias_o


if __name__ == "__main__":
    # Small shapes consistent with the module: x is (batch, in_dim).
    num_layers = 3
    in_dim = 16
    embed_dim = 32
    batch = 8

    key = jax.random.PRNGKey(0)
    kx, kw, kb0, kbe, kbo, kbeta, kalpha = jax.random.split(key, 7)

    k_W = float(jnp.sqrt(1.0 / in_dim))
    k_E = float(jnp.sqrt(1.0 / embed_dim))

    x = jax.random.normal(kx, (batch, in_dim), dtype=jnp.float32)

    # Parameter init mirroring the module's __init__:
    #   W ~ U(±sqrt(1/in_dim)); bias[0] ~ U(±sqrt(1/in_dim));
    #   bias[1..L-1] ~ U(±sqrt(1/embed_dim)); bias[L] (output) ~ U(±sqrt(1/embed_dim));
    #   beta, alpha ~ U(-0.5, 0.5).
    W = jax.random.uniform(kw, (embed_dim, in_dim), jnp.float32, -k_W, k_W)
    bias0 = jax.random.uniform(kb0, (1, embed_dim), jnp.float32, -k_W, k_W)
    bias_rest = jax.random.uniform(
        kbe, (num_layers - 1, embed_dim), jnp.float32, -k_E, k_E)
    bias_e = jnp.concatenate([bias0, bias_rest], axis=0)     # (L, embed_dim)
    bias_o = jax.random.uniform(kbo, (in_dim,), jnp.float32, -k_E, k_E)
    beta = jax.random.uniform(
        kbeta, (num_layers, embed_dim), jnp.float32, -0.5, 0.5)
    alpha = jax.random.uniform(
        kalpha, (num_layers, embed_dim), jnp.float32, -0.5, 0.5)

    out = cascade_grad_net(x, W, bias_e, bias_o, beta, alpha,
                           num_layers=num_layers)
    out = jax.block_until_ready(out)
    assert out.shape == (batch, in_dim)

    # Primary check: reference with matching precision (bf16 MXU operands,
    # f32 accumulation & elementwise).
    ref_bf16 = _reference(x, W, bias_e, bias_o, beta, alpha, num_layers,
                          mxu_dtype=jnp.bfloat16)
    assert jnp.allclose(out, ref_bf16, atol=2e-3, rtol=2e-3), \
        "mismatch vs matched-precision reference"

    # Sanity check vs full-f32 reference (bounds the bf16 MXU rounding error).
    ref_f32 = _reference(x, W, bias_e, bias_o, beta, alpha, num_layers,
                         mxu_dtype=jnp.float32)
    assert jnp.allclose(out, ref_f32, atol=3e-2, rtol=3e-2), \
        "mismatch vs f32 reference"

    print("KERNEL_OK")
</pallas_src>

<mosaic_0001>
module attributes {stable_mosaic.version = 11 : i64} {
  func.func @_cascade_kernel(%arg0: i32, %arg1: memref<16x128xbf16, #tpu.memory_space<vmem>>, %arg2: memref<32x16xbf16, #tpu.memory_space<vmem>>, %arg3: memref<16x32xbf16, #tpu.memory_space<vmem>>, %arg4: memref<32x9xf32, #tpu.memory_space<vmem>>, %arg5: memref<16x1xf32, #tpu.memory_space<vmem>>, %arg6: memref<16x128xf32, #tpu.memory_space<vmem>>) attributes {dimension_semantics = [#tpu.dimension_semantics<parallel>], iteration_bounds = array<i64: 1>, scalar_prefetch = 0 : i64, scratch_operands = 0 : i64, tpu.core_type = #tpu.core_type<tc>, window_params = [{transform_indices = @transform_0, window_bounds = array<i64: 16, 128>}, {pipeline_mode = #tpu.pipeline_mode<synchronous>, transform_indices = @transform_1, window_bounds = array<i64: 32, 16>}, {pipeline_mode = #tpu.pipeline_mode<synchronous>, transform_indices = @transform_2, window_bounds = array<i64: 16, 32>}, {pipeline_mode = #tpu.pipeline_mode<synchronous>, transform_indices = @transform_3, window_bounds = array<i64: 32, 9>}, {pipeline_mode = #tpu.pipeline_mode<synchronous>, transform_indices = @transform_4, window_bounds = array<i64: 16, 1>}, {transform_indices = @transform_5, window_bounds = array<i64: 16, 128>}]} {
    %c0 = arith.constant 0 : index
    %c0_0 = arith.constant 0 : index
    %0 = vector.load %arg1[%c0, %c0_0] : memref<16x128xbf16, #tpu.memory_space<vmem>>, vector<16x128xbf16>
    %c0_1 = arith.constant 0 : index
    %c0_2 = arith.constant 0 : index
    %1 = vector.load %arg2[%c0_1, %c0_2] : memref<32x16xbf16, #tpu.memory_space<vmem>>, vector<32x16xbf16>
    %c0_3 = arith.constant 0 : index
    %c0_4 = arith.constant 0 : index
    %2 = vector.load %arg3[%c0_3, %c0_4] : memref<16x32xbf16, #tpu.memory_space<vmem>>, vector<16x32xbf16>
    %cst = arith.constant dense<0.000000e+00> : vector<32x128xf32>
    %3 = tpu.matmul %1, %0, %cst {dimension_numbers = #tpu.dot_dimension_numbers<[1], [0], [0], [1], [0, 0, 1, 1], [], []>} : vector<32x16xbf16>, vector<16x128xbf16>, vector<32x128xf32> -> vector<32x128xf32>
    %c0_5 = arith.constant 0 : index
    %c0_6 = arith.constant 0 : index
    %4 = vector.load %arg4[%c0_5, %c0_6] : memref<32x9xf32, #tpu.memory_space<vmem>>, vector<32x1xf32>
    %c0_7 = arith.constant 0 : index
    %c1 = arith.constant 1 : index
    %5 = vector.load %arg4[%c0_7, %c1] : memref<32x9xf32, #tpu.memory_space<vmem>>, vector<32x1xf32>
    %c0_8 = arith.constant 0 : index
    %c2 = arith.constant 2 : index
    %6 = vector.load %arg4[%c0_8, %c2] : memref<32x9xf32, #tpu.memory_space<vmem>>, vector<32x1xf32>
    %c0_9 = arith.constant 0 : index
    %c3 = arith.constant 3 : index
    %7 = vector.load %arg4[%c0_9, %c3] : memref<32x9xf32, #tpu.memory_space<vmem>>, vector<32x1xf32>
    %c0_10 = arith.constant 0 : index
    %c4 = arith.constant 4 : index
    %8 = vector.load %arg4[%c0_10, %c4] : memref<32x9xf32, #tpu.memory_space<vmem>>, vector<32x1xf32>
    %c0_11 = arith.constant 0 : index
    %c5 = arith.constant 5 : index
    %9 = vector.load %arg4[%c0_11, %c5] : memref<32x9xf32, #tpu.memory_space<vmem>>, vector<32x1xf32>
    %c0_12 = arith.constant 0 : index
    %c6 = arith.constant 6 : index
    %10 = vector.load %arg4[%c0_12, %c6] : memref<32x9xf32, #tpu.memory_space<vmem>>, vector<32x1xf32>
    %c0_13 = arith.constant 0 : index
    %c7 = arith.constant 7 : index
    %11 = vector.load %arg4[%c0_13, %c7] : memref<32x9xf32, #tpu.memory_space<vmem>>, vector<32x1xf32>
    %c0_14 = arith.constant 0 : index
    %c8 = arith.constant 8 : index
    %12 = vector.load %arg4[%c0_14, %c8] : memref<32x9xf32, #tpu.memory_space<vmem>>, vector<32x1xf32>
    %c0_15 = arith.constant 0 : index
    %c0_16 = arith.constant 0 : index
    %13 = vector.load %arg5[%c0_15, %c0_16] : memref<16x1xf32, #tpu.memory_space<vmem>>, vector<16x1xf32>
    %14 = vector.broadcast %4 : vector<32x1xf32> to vector<32x128xf32>
    %15 = arith.mulf %14, %3 : vector<32x128xf32>
    %16 = vector.broadcast %7 : vector<32x1xf32> to vector<32x128xf32>
    %17 = arith.addf %15, %16 : vector<32x128xf32>
    %18 = vector.broadcast %5 : vector<32x1xf32> to vector<32x128xf32>
    %19 = arith.mulf %18, %3 : vector<32x128xf32>
    %20 = vector.broadcast %8 : vector<32x1xf32> to vector<32x128xf32>
    %21 = arith.addf %19, %20 : vector<32x128xf32>
    %22 = math.tanh %17 : vector<32x128xf32>
    %23 = vector.broadcast %10 : vector<32x1xf32> to vector<32x128xf32>
    %24 = arith.mulf %23, %22 : vector<32x128xf32>
    %25 = arith.addf %21, %24 : vector<32x128xf32>
    %26 = vector.broadcast %6 : vector<32x1xf32> to vector<32x128xf32>
    %27 = arith.mulf %26, %3 : vector<32x128xf32>
    %28 = vector.broadcast %9 : vector<32x1xf32> to vector<32x128xf32>
    %29 = arith.addf %27, %28 : vector<32x128xf32>
    %30 = math.tanh %25 : vector<32x128xf32>
    %31 = vector.broadcast %11 : vector<32x1xf32> to vector<32x128xf32>
    %32 = arith.mulf %31, %30 : vector<32x128xf32>
    %33 = arith.addf %29, %32 : vector<32x128xf32>
    %34 = math.tanh %33 : vector<32x128xf32>
    %35 = vector.broadcast %12 : vector<32x1xf32> to vector<32x128xf32>
    %36 = arith.mulf %35, %34 : vector<32x128xf32>
    %37 = arith.truncf %36 : vector<32x128xf32> to vector<32x128xbf16>
    %cst_17 = arith.constant dense<0.000000e+00> : vector<16x128xf32>
    %38 = tpu.matmul %2, %37, %cst_17 {dimension_numbers = #tpu.dot_dimension_numbers<[1], [0], [0], [1], [0, 0, 1, 1], [], []>} : vector<16x32xbf16>, vector<32x128xbf16>, vector<16x128xf32> -> vector<16x128xf32>
    %39 = vector.broadcast %13 : vector<16x1xf32> to vector<16x128xf32>
    %40 = arith.addf %38, %39 : vector<16x128xf32>
    %c0_18 = arith.constant 0 : index
    %c0_19 = arith.constant 0 : index
    %41 = vector.load %arg6[%c0_18, %c0_19] : memref<16x128xf32, #tpu.memory_space<vmem>>, vector<16x128xf32>
    tpu.vector_store %arg6[%c0_18, %c0_19], %40 {strides = array<i32>} : memref<16x128xf32, #tpu.memory_space<vmem>>, vector<16x128xf32>,
    return
  }
  func.func @transform_0(%arg0: i32) -> (i32, i32) {
    %c0_i32 = arith.constant 0 : i32
    %c0_i32_0 = arith.constant 0 : i32
    return %c0_i32, %arg0 : i32, i32
  }
  func.func @transform_1(%arg0: i32) -> (i32, i32) {
    %c0_i32 = arith.constant 0 : i32
    %c0_i32_0 = arith.constant 0 : i32
    %c0_i32_1 = arith.constant 0 : i32
    return %c0_i32, %c0_i32_0 : i32, i32
  }
  func.func @transform_2(%arg0: i32) -> (i32, i32) {
    %c0_i32 = arith.constant 0 : i32
    %c0_i32_0 = arith.constant 0 : i32
    %c0_i32_1 = arith.constant 0 : i32
    return %c0_i32, %c0_i32_0 : i32, i32
  }
  func.func @transform_3(%arg0: i32) -> (i32, i32) {
    %c0_i32 = arith.constant 0 : i32
    %c0_i32_0 = arith.constant 0 : i32
    %c0_i32_1 = arith.constant 0 : i32
    return %c0_i32, %c0_i32_0 : i32, i32
  }
  func.func @transform_4(%arg0: i32) -> (i32, i32) {
    %c0_i32 = arith.constant 0 : i32
    %c0_i32_0 = arith.constant 0 : i32
    %c0_i32_1 = arith.constant 0 : i32
    return %c0_i32, %c0_i32_0 : i32, i32
  }
  func.func @transform_5(%arg0: i32) -> (i32, i32) {
    %c0_i32 = arith.constant 0 : i32
    %c0_i32_0 = arith.constant 0 : i32
    return %c0_i32, %arg0 : i32, i32
  }
}

</mosaic_0001>

<bundles_post_ra>
// kernel: tpu_custom_call.1
= control target key start
LH: loop header
LB: loop body
LE: loop exit
PB: predicated region body
PF: predicated region fallthrough
CT: control target
= control target key end

     0   :  { %vm46_vm0 = vcmask 130048   ;;  %v510_v3 = vmov 3   ;;  %v511_v6 = vmov 0   ;;  %s617_s0 = inlined_call_operand.vmem [shape: bf16[16,128], index: 0, kind: input, shape index: {}]   ;;  %s618_s1 = inlined_call_operand.vmem [shape: bf16[32,16], index: 1, kind: input, shape index: {}]   ;;  %s619_s2 = inlined_call_operand.vmem [shape: bf16[16,32], index: 2, kind: input, shape index: {}]   ;;  %s620_s3 = inlined_call_operand.vmem [shape: f32[32,9], index: 3, kind: input, shape index: {}]   ;;  %s621_s4 = inlined_call_operand.vmem [shape: f32[16,1], index: 4, kind: input, shape index: {}]   ;;  %s622_s5 = inlined_call_operand.hbm [shape: f32[16,128], index: 5, kind: output, shape index: {}]  }
   0x1   :  { %v458_v0 = vld [vmem:[%s617_s0] sm:$0xff]   ;;  %v460_v2 = vld [vmem:[%s618_s1 + $0x8] sm:$0xff]   ;;  %434 = vset.pattern.permute.xlu1 %v510_v3  ;;  %433 = vset.pattern.permute.xlu0 %v511_v6 }
   0x2   :  { %v459_v1 = vld [vmem:[%s618_s1] sm:$0xff]   ;;  %405 = vmatprep.subr.bf16.mxu0 %v458_v0  ;;  %v103_v5 = vld [vmem:[%s620_s3 + $0x8] sm:$0xff] }
   0x3   :  { %406 = vmatpush3.bf16.msra.mxu0 %v458_v0  ;;  %407 = vmatprep.mubr.msk.bf16.mxu0 %vm46_vm0, %v459_v1  ;;  %v566_v4 = vld [vmem:[%s620_s3] sm:$0xff] }
   0x4   :  { %133 = vperm.xlu1 %434, %v566_v4   ;;  %110 = vperm.xlu0 %433, %v566_v4  }
   0x5   :  { %10 = vsyncpa [#allocation3], 0  ;;  %v105_v7 = vld [vmem:[%s620_s3 + $0x18] sm:$0xff]  ;;  %v104_v8 = vld [vmem:[%s620_s3 + $0x10] sm:$0xff]  ;;  %v512_v9 = vmov 1   ;;  %v513_v10 = vmov 4  }
   0x6   :  { %408 = vmatmul.mubr.msk.bf16.vlgmr.msra.gmra.mrb[0].mxu0 %vm46_vm0, %v460_v2  ;;  %v514_v11 = vmov 6   ;;  %v515_v12 = vmov 2   ;;  %v516_v13 = vmov 7   ;;  %v517_v14 = vmov 8   ;;  %v106_v20 = vld [vmem:[%s621_s4] sm:$0xff]  ;;  %v107_v21 = vld [vmem:[%s621_s4 + $0x8] sm:$0xff] }
   0x7   :  { %v518_v15 = vmov 5   ;;  %v519_v18 = vmov 0.0   ;;  %vm520_vm1 = vmmov 0   ;;  %vm329_vm2 = vcmask 261120   ;;  %s521_s9 = smov [#allocation2]  }
   0x8   :  { %137 = vperm.xlu1 %434, %v103_v5   ;;  %115 = vperm.xlu0 %433, %v103_v5   ;;  %s381_s10 = sshll.u32 %s521_s9, 4  ;;  %s382_s10 = int_to_ptr.vmem [resolvable:$true] %s381_s10 }
   0x9   :  { %411 = vmatprep.subr.bf16.mxu1 %v519_v18  ;;  %415 = vmatprep.mubr.msk.bf16.mxu1 %vm520_vm1, %v519_v18  ;;  %s486_s11 = scalar_lea.vmem %s382_s10, 256  ;;  %p491_p1 = scmp.lt.s32.totalorder %s382_s10, %s382_s10 }
   0xa   :  { %p487_p0 = scmp.ne.s32.totalorder %s382_s10, %s486_s11  ;;  %p492_p2 = scmp.lt.s32.totalorder %s486_s11, %s486_s11 }
   0xc   :  { %435 = vset.pattern.permute.xlu1 %v511_v6  ;;  %120 = vperm.xlu0 %433, %v104_v8   ;;  %p493_p3 = por %p492_p2, %p491_p1 }
   0xd   :  { %125 = vperm.xlu1 %435, %v105_v7  }
   0xe   :  { %p494_p4 = pnand %p493_p3, %p487_p0 }
  0x10   :  { %436 = vset.pattern.permute.xlu0 %v510_v3 }
  0x11   :  { %437 = vset.pattern.permute.xlu1 %v510_v3  ;;  %141 = vperm.xlu0 %436, %v104_v8  }
  0x12   :  { %145 = vperm.xlu1 %437, %v105_v7  }
  0x15   :  { %439 = vset.pattern.permute.xlu0 %v512_v9 }
  0x16   :  { %438 = vset.pattern.permute.xlu1 %v512_v9  ;;  %157 = vperm.xlu0 %439, %v103_v5  }
  0x17   :  { %153 = vperm.xlu1 %438, %v566_v4  }
  0x1a   :  { %165 = vperm.xlu0 %439, %v105_v7  }
  0x1b   :  { %440 = vset.pattern.permute.xlu1 %v513_v10 }
  0x1c   :  { %173 = vperm.xlu1 %440, %v566_v4  }
  0x1e   :  { %443 = vset.pattern.permute.xlu0 %v514_v11 }
  0x1f   :  { %197 = vperm.xlu0 %443, %v566_v4  }
  0x20   :  { %177 = vperm.xlu1 %440, %v103_v5  }
  0x23   :  { %205 = vperm.xlu0 %443, %v104_v8  }
  0x24   :  { %441 = vset.pattern.permute.xlu1 %v514_v11 }
  0x25   :  { %201 = vperm.xlu1 %441, %v103_v5  }
  0x27   :  { %447 = vset.pattern.permute.xlu0 %v515_v12 }
  0x28   :  { %225 = vperm.xlu0 %447, %v103_v5  }
  0x29   :  { %442 = vset.pattern.permute.xlu1 %v512_v9 }
  0x2a   :  { %161 = vperm.xlu1 %442, %v104_v8  }
  0x2c   :  { %233 = vperm.xlu0 %447, %v105_v7  }
  0x2e   :  { %444 = vset.pattern.permute.xlu1 %v513_v10 }
  0x2f   :  { %181 = vperm.xlu1 %444, %v104_v8  }
  0x30   :  { %451 = vset.pattern.permute.xlu0 %v516_v13 }
  0x31   :  { %265 = vperm.xlu0 %451, %v566_v4  }
  0x33   :  { %185 = vperm.xlu1 %444, %v105_v7  }
  0x35   :  { %273 = vperm.xlu0 %451, %v104_v8  }
  0x37   :  { %445 = vset.pattern.permute.xlu1 %v514_v11 }
  0x38   :  { %209 = vperm.xlu1 %445, %v105_v7  }
  0x39   :  { %455 = vset.pattern.permute.xlu0 %v517_v14 }
  0x3a   :  { %297 = vperm.xlu0 %455, %v103_v5  }
  0x3c   :  { %446 = vset.pattern.permute.xlu1 %v515_v12 }
  0x3d   :  { %221 = vperm.xlu1 %446, %v566_v4  }
  0x3e   :  { %456 = vset.pattern.permute.xlu0 %v511_v6 }
  0x3f   :  { %316 = vperm.xlu0 %456, %v106_v20  }
  0x41   :  { %448 = vset.pattern.permute.xlu1 %v518_v15 }
  0x42   :  { %241 = vperm.xlu1 %448, %v566_v4  }
  0x46   :  { %245 = vperm.xlu1 %448, %v103_v5  }
  0x4a   :  { %449 = vset.pattern.permute.xlu1 %v516_v13 }
  0x4b   :  { %269 = vperm.xlu1 %449, %v103_v5  }
  0x4f   :  { %450 = vset.pattern.permute.xlu1 %v515_v12 }
  0x50   :  { %229 = vperm.xlu1 %450, %v104_v8  }
  0x54   :  { %452 = vset.pattern.permute.xlu1 %v518_v15 }
  0x55   :  { %249 = vperm.xlu1 %452, %v104_v8  }
  0x59   :  { %253 = vperm.xlu1 %452, %v105_v7  }
  0x5d   :  { %453 = vset.pattern.permute.xlu1 %v516_v13 }
  0x5e   :  { %277 = vperm.xlu1 %453, %v105_v7  }
  0x62   :  { %454 = vset.pattern.permute.xlu1 %v517_v14 }
  0x63   :  { %293 = vperm.xlu1 %454, %v566_v4  }
  0x67   :  { %301 = vperm.xlu1 %454, %v104_v8  }
  0x6b   :  { %305 = vperm.xlu1 %454, %v105_v7  }
  0x6f   :  { %457 = vset.pattern.permute.xlu1 %v511_v6 }
  0x70   :  { %321 = vperm.xlu1 %457, %v107_v21  }
  0x83   :  { %v134_v16 = vpop.permute.xlu1 %133  ;;  %v111_v27 = vpop.permute.xlu0 %110 }
  0x87   :  { %v138_v17 = vpop.permute.xlu1 %137  ;;  %v116_v29 = vpop.permute.xlu0 %115 }
  0x8b   :  { %v121_v31 = vpop.permute.xlu0 %120 }
  0x8c   :  { %v126_v19 = vpop.permute.xlu1 %125 }
  0x90   :  { %v142_v33 = vpop.permute.xlu0 %141 }
  0x91   :  { %v146_v22 = vpop.permute.xlu1 %145 }
  0x95   :  { %v158_v35 = vpop.permute.xlu0 %157 }
  0x96   :  { %v154_v23 = vpop.permute.xlu1 %153 }
  0x99   :  { %v166_v37 = vpop.permute.xlu0 %165 }
  0x9b   :  { %v174_v24 = vpop.permute.xlu1 %173 }
  0x9e   :  { %v198_v39 = vpop.permute.xlu0 %197 }
  0x9f   :  { %v178_v25 = vpop.permute.xlu1 %177 }
  0xa2   :  { %v206_v52 = vpop.permute.xlu0 %205 }
  0xa4   :  { %v202_v26 = vpop.permute.xlu1 %201 }
  0xa7   :  { %v226_v55 = vpop.permute.xlu0 %225 }
  0xa9   :  { %v162_v28 = vpop.permute.xlu1 %161 }
  0xab   :  { %v234_v6 = vpop.permute.xlu0 %233 }
  0xae   :  { %v182_v30 = vpop.permute.xlu1 %181 }
  0xb0   :  { %v266_v15 = vpop.permute.xlu0 %265 }
  0xb2   :  { %v186_v32 = vpop.permute.xlu1 %185 }
  0xb4   :  { %v274_v20 = vpop.permute.xlu0 %273 }
  0xb7   :  { %v210_v34 = vpop.permute.xlu1 %209 }
  0xbc   :  { %v222_v36 = vpop.permute.xlu1 %221 }
  0xc1   :  { %v242_v38 = vpop.permute.xlu1 %241 }
  0xc5   :  { %v598_v41 = vpop.permute.xlu1 %245 }
  0xca   :  { %v270_v54 = vpop.permute.xlu1 %269 }
  0xcf   :  { %v230_v57 = vpop.permute.xlu1 %229 }
  0xd4   :  { %v250_v9 = vpop.permute.xlu1 %249 }
  0xd9   :  { %v409_v40 = vpop.f32.mrb[0].mxu0 }
  0xda   :  { %v130_v42 = vmul.f32 %v409_v40, %v121_v31  ;;  %v87_v43 = vpop.f32.mrb[1].mxu0  ;;  %v170_v56 = vmul.f32 %v409_v40, %v162_v28 }
  0xdb   :  { %v128_v44 = vmul.f32 %v111_v27, %v87_v43  ;;  %v410_v45 = vpop.f32.mrb[2].mxu0  ;;  %v168_v58 = vmul.f32 %v154_v23, %v87_v43 }
  0xdc   :  { %v150_v46 = vadd.f32 %v142_v33, %v130_v42  ;;  %v131_v47 = vmul.f32 %v410_v45, %v126_v19  ;;  %v90_v48 = vpop.f32.mrb[3].mxu0  ;;  %v171_v59 = vmul.f32 %v410_v45, %v166_v37  ;;  %v190_v63 = vadd.f32 %v182_v30, %v170_v56 }
  0xdd   :  { %v148_v49 = vadd.f32 %v134_v16, %v128_v44  ;;  %v129_v50 = vmul.f32 %v116_v29, %v90_v48  ;;  %v169_v61 = vmul.f32 %v158_v35, %v90_v48  ;;  %v188_v2 = vadd.f32 %v174_v24, %v168_v58  ;;  %v254_v16 = vpop.permute.xlu1 %253 }
  0xde   :  { %462 = vtanh.f32 %v150_v46  ;;  %v151_v51 = vadd.f32 %v146_v22, %v131_v47  ;;  %v191_v7 = vadd.f32 %v186_v32, %v171_v59  ;;  %v236_v19 = vmul.f32 %v222_v36, %v87_v43 }
  0xdf   :  { %464 = vtanh.f32 %v148_v49  ;;  %v149_v53 = vadd.f32 %v138_v17, %v129_v50  ;;  %v189_v11 = vadd.f32 %v178_v25, %v169_v61  ;;  %v238_v17 = vmul.f32 %v409_v40, %v230_v57 }
  0xe0   :  { %466 = vtanh.f32 %v151_v51  ;;  %v239_v21 = vmul.f32 %v410_v45, %v234_v6  ;;  %v237_v24 = vmul.f32 %v226_v55, %v90_v48 }
  0xe1   :  { %468 = vtanh.f32 %v149_v53  ;;  %v278_v22 = vpop.permute.xlu1 %277  ;;  %v258_v28 = vadd.f32 %v250_v9, %v238_v17 }
  0xe2   :  { %v259_v32 = vadd.f32 %v254_v16, %v239_v21  ;;  %v257_v35 = vadd.f32 %v598_v41, %v237_v24 }
  0xe5   :  { %v294_v40 = vpop.permute.xlu1 %293 }
  0xe8   :  { %v463_v60 = vpop.eup %462 }
  0xe9   :  { %v465_v62 = vpop.eup %464  ;;  %v214_v0 = vmul.f32 %v463_v60, %v206_v52  ;;  %v302_v43 = vpop.permute.xlu1 %301 }
  0xea   :  { %v467_v1 = vpop.eup %466  ;;  %v212_v3 = vmul.f32 %v465_v62, %v198_v39 }
  0xeb   :  { %v469_v4 = vpop.eup %468  ;;  %v218_v5 = vadd.f32 %v214_v0, %v190_v63  ;;  %v215_v8 = vmul.f32 %v467_v1, %v210_v34 }
  0xec   :  { %v216_v10 = vadd.f32 %v212_v3, %v188_v2  ;;  %v213_v12 = vmul.f32 %v469_v4, %v202_v26  ;;  %v256_v26 = vadd.f32 %v242_v38, %v236_v19  ;;  %v298_v38 = vpop.permute.xlu0 %297 }
  0xed   :  { %470 = vtanh.f32 %v218_v5  ;;  %v219_v13 = vadd.f32 %v215_v8, %v191_v7  ;;  %v306_v47 = vpop.permute.xlu1 %305 }
  0xee   :  { %472 = vtanh.f32 %v216_v10  ;;  %v217_v14 = vadd.f32 %v213_v12, %v189_v11 }
  0xef   :  { %474 = vtanh.f32 %v219_v13 }
  0xf0   :  { %476 = vtanh.f32 %v217_v14  ;;  %v317_v55 = vpop.permute.xlu0 %316 }
  0xf1   :  { %v322_v57 = vpop.permute.xlu1 %321 }
  0xf7   :  { %v471_v23 = vpop.eup %470 }
  0xf8   :  { %v473_v27 = vpop.eup %472  ;;  %v282_v29 = vmul.f32 %v471_v23, %v274_v20 }
  0xf9   :  { %v475_v25 = vpop.eup %474  ;;  %v280_v30 = vmul.f32 %v473_v27, %v266_v15 }
  0xfa   :  { %v477_v31 = vpop.eup %476  ;;  %v286_v33 = vadd.f32 %v282_v29, %v258_v28  ;;  %v283_v34 = vmul.f32 %v475_v25, %v278_v22 }
  0xfb   :  { %v281_v37 = vmul.f32 %v477_v31, %v270_v54  ;;  %v284_v39 = vadd.f32 %v280_v30, %v256_v26  ;;  %v461_v54 = vld [vmem:[%s619_s2] sm:$0xff]  }
  0xfc   :  { %478 = vtanh.f32 %v286_v33  ;;  %v287_v36 = vadd.f32 %v283_v34, %v259_v32 }
  0xfd   :  { %v285_v42 = vadd.f32 %v281_v37, %v257_v35  ;;  %480 = vtanh.f32 %v284_v39 }
  0xfe   :  { %482 = vtanh.f32 %v287_v36 }
  0xff   :  { %484 = vtanh.f32 %v285_v42 }
 0x106   :  { %v479_v44 = vpop.eup %478 }
 0x107   :  { %v481_v45 = vpop.eup %480  ;;  %v310_v49 = vmul.f32 %v479_v44, %v302_v43 }
 0x108   :  { %v483_v46 = vpop.eup %482  ;;  %v308_v51 = vmul.f32 %v481_v45, %v294_v40 }
 0x109   :  { %v485_v48 = vpop.eup %484  ;;  %v311_v50 = vmul.f32 %v483_v46, %v306_v47 }
 0x10a   :  { %v309_v41 = vmul.f32 %v485_v48, %v298_v38 }
 0x10b   :  { %v313_v52 = vpack.c.bf16 %v311_v50, %v310_v49 }
 0x10c   :  { %v312_v53 = vpack.c.bf16 %v309_v41, %v308_v51 }
 0x10e   :  { %412 = vmatpush3.bf16.msra.mxu1 %v312_v53 }
 0x10f   :  { %413 = vmatprep.subr.bf16.mxu1 %v519_v18 }
 0x112   :  { %414 = vmatpush3.bf16.msra.mxu1 %v313_v52 }
 0x115   :  { %416 = vmatmul.mubr.msk.bf16.vlgmr.msra.gmra.mrb[0].mxu1 %vm329_vm2, %v461_v54 }
 0x1e8   :  { %v367_v56 = vpop.f32.mrb[0].mxu1 }
 0x1e9   :  { %v368_v58 = vadd.f32 %v367_v56, %v317_v55  ;;  %v417_v59 = vpop.f32.mrb[1].mxu1 }
 0x1ea   :  { %v370_v60 = vpop.f32.mrb[2].mxu1 }
 0x1eb   :  { %374 = vst [vmem:[#allocation2] sm:$0xff] %v368_v58  ;;  %v371_v61 = vadd.f32 %v370_v60, %v322_v57  ;;  %v418_v62 = vpop.f32.mrb[3].mxu1 }
 0x1ed   :  { %375 = vst [vmem:[#allocation2 + $0x8] sm:$0xff] %v371_v61 }
 0x1ee   :  { %497 = shalt.err (!%p494_p4)
}
 0x1ef   :  { %s498_s13 = scalar_lea.hbm %s622_s5, 256 }
 0x1f0   :  { %p499_p5 = scmp.ne.s32.totalorder %s622_s5, %s498_s13  ;;  %p502_p6 = scmp.lt.u32.totalorder %s498_s13, %s622_s5 }
 0x1f2   :  { %p504_p7 = pnand %p502_p6, %p499_p5 }
 0x1f4   :  { %507 = shalt.err (!%p504_p7)
}
 0x1f5   :  { %s522_s18 = smov 128   ;;  %s523_s19 = smov 8  }
 0x1f6   :  { %387 = dma.vmem_to_hbm [thread:$0]  %s382_s10, 256, %s622_s5, [#allocation3], %s522_s18, %s522_s18, %s523_s19  }
 0x1f7   :  { %508 = dma.done.wait [#allocation3], 256  }
 0x1f8   :  { %509 = vsyncadd [#allocation3], 4294967040 }
 0x1f9   :  { %391 = vsyncpa [#allocation3], 1 }

</bundles_post_ra>
